<compile_context>
chip_gen: v7x
topology: tpu7x:2x2x1
jax: 0.10.0
libtpu: 0.0.40
codegen_flags: <defaults>
</compile_context>

<pallas_src>
import functools

import jax
import jax.numpy as jnp
from jax.experimental import pallas as pl
from jax.experimental.pallas import tpu as pltpu


def _round_up(n, m):
    return ((n + m - 1) // m) * m


# ----------------------------------------------------------------------------
# Fused MLP kernel: one (TM, K) bf16 row tile -> (TM, N) f32 Q-values.
# ----------------------------------------------------------------------------
def _mlp_kernel(x_ref, w1_ref, b1_ref, w2_ref, b2_ref, w3_ref, b3_ref, o_ref):
    # Layer 1: (TM, 8) bf16 @ (8, 128) bf16 -> f32 accumulate.
    h = jnp.dot(x_ref[...], w1_ref[...], preferred_element_type=jnp.float32)
    h = jnp.maximum(h + b1_ref[...], 0.0)
    # Layer 2: (TM, 128) bf16 @ (128, 128) bf16 -> f32.
    h = jnp.dot(h.astype(jnp.bfloat16), w2_ref[...],
                preferred_element_type=jnp.float32)
    h = jnp.maximum(h + b2_ref[...], 0.0)
    # Layer 3: (TM, 128) bf16 @ (128, 128) bf16 -> f32.
    q = jnp.dot(h.astype(jnp.bfloat16), w3_ref[...],
                preferred_element_type=jnp.float32)
    o_ref[...] = q + b3_ref[...]


# ----------------------------------------------------------------------------
# Wrapper: minimal batch padding, fused kernel, slice the real Q-values out.
# ----------------------------------------------------------------------------
def qnet_forward(padded_params, x, *, n_actions, tile_m=1024):
    """x: (B, obs_dim) float -> (B, n_actions) float32 Q-values."""
    B, obs_dim = x.shape
    w1, b1 = padded_params["w1"], padded_params["b1"]
    w2, b2 = padded_params["w2"], padded_params["b2"]
    w3, b3 = padded_params["w3"], padded_params["b3"]
    K, H1 = w1.shape          # K = round_up(obs_dim, 8), H1 = 128
    H2 = w2.shape[1]          # 128
    N = w3.shape[1]           # 128 (>= n_actions)

    # Adaptive row tile: pad B only to the next multiple of 8, keep >= 2 grid
    # steps whenever possible so v7x's two TensorCores both get work, and cap
    # the tile at tile_m.
    B8 = _round_up(B, 8)
    steps = pl.cdiv(B8, tile_m)
    if B8 >= 16:
        steps = max(steps, 2)
    TM = _round_up(pl.cdiv(B8, steps), 8)
    B_pad = TM * steps

    # Avoid an extra padded HBM copy of the activations when possible.
    if B == B_pad and obs_dim == K:
        x_in = x.astype(jnp.bfloat16)
    else:
        # TODO(synk): could use allow_input_fusion to fuse this pad into the
        # pallas_call; it is already 16x cheaper than before (K=8, not 128).
        x_in = jnp.zeros((B_pad, K), jnp.bfloat16)
        x_in = x_in.at[:B, :obs_dim].set(x.astype(jnp.bfloat16))

    # Advisory cost for XLA's scheduler, on the dims the kernel actually runs.
    flops = 2 * B_pad * (K * H1 + H1 * H2 + H2 * N)
    bytes_accessed = (2 * (B_pad * K + K * H1 + H1 * H2 + H2 * N)   # bf16
                      + 4 * (H1 + H2 + N + B_pad * N))              # f32

    out = pl.pallas_call(
        _mlp_kernel,
        out_shape=jax.ShapeDtypeStruct((B_pad, N), jnp.float32),
        grid_spec=pltpu.PrefetchScalarGridSpec(
            num_scalar_prefetch=0,
            grid=(steps,),
            in_specs=[
                pl.BlockSpec((TM, K), lambda i: (i, 0)),   # activation rows
                pl.BlockSpec((K, H1), lambda i: (0, 0)),   # w1 (resident)
                pl.BlockSpec((1, H1), lambda i: (0, 0)),   # b1
                pl.BlockSpec((H1, H2), lambda i: (0, 0)),  # w2
                pl.BlockSpec((1, H2), lambda i: (0, 0)),   # b2
                pl.BlockSpec((H2, N), lambda i: (0, 0)),   # w3
                pl.BlockSpec((1, N), lambda i: (0, 0)),    # b3
            ],
            out_specs=pl.BlockSpec((TM, N), lambda i: (i, 0)),
        ),
        compiler_params=pltpu.CompilerParams(
            dimension_semantics=("parallel",),
            vmem_limit_bytes=32 * 1024 * 1024,
        ),
        cost_estimate=pl.CostEstimate(
            flops=flops, transcendentals=0, bytes_accessed=bytes_accessed),
    )(x_in, w1, b1, w2, b2, w3, b3)

    return out[:B, :n_actions]


# ----------------------------------------------------------------------------
# Parameters (PyTorch-default-like uniform(-1/sqrt(fan_in), +1/sqrt(fan_in)))
# ----------------------------------------------------------------------------
def init_params(key, obs_dim, n_actions):
    ks = jax.random.split(key, 6)

    def u(k, shape, fan_in):
        bound = 1.0 / jnp.sqrt(jnp.float32(fan_in))
        return jax.random.uniform(k, shape, jnp.float32, -bound, bound)

    return {
        "w1": u(ks[0], (obs_dim, 120), obs_dim),
        "b1": u(ks[1], (120,), obs_dim),
        "w2": u(ks[2], (120, 84), 120),
        "b2": u(ks[3], (84,), 120),
        "w3": u(ks[4], (84, n_actions), 84),
        "b3": u(ks[5], (n_actions,), 84),
    }


def pad_params(params):
    """One-time host-side zero-padding.

    obs dim is padded only to a multiple of 8 (contraction dim, tiny), hidden
    and action dims to multiples of 128 (lane-dense).  Weights are stored as
    bf16 (MXU-native), biases stay f32.  Padding is exact: padded hidden units
    get zero pre-activation and their outgoing weight rows are zero.
    """
    def pad2(w, rp, cp):
        out = jnp.zeros((rp, cp), jnp.float32)
        return out.at[:w.shape[0], :w.shape[1]].set(w).astype(jnp.bfloat16)

    def pad1(b, cp):
        out = jnp.zeros((1, cp), jnp.float32)
        return out.at[0, :b.shape[0]].set(b)

    obs_dim, h1 = params["w1"].shape
    h2 = params["w2"].shape[1]
    n = params["w3"].shape[1]
    Kp = _round_up(obs_dim, 8)
    H1p, H2p, Np = (_round_up(d, 128) for d in (h1, h2, n))
    return {
        "w1": pad2(params["w1"], Kp, H1p), "b1": pad1(params["b1"], H1p),
        "w2": pad2(params["w2"], H1p, H2p), "b2": pad1(params["b2"], H2p),
        "w3": pad2(params["w3"], H2p, Np), "b3": pad1(params["b3"], Np),
    }


# ----------------------------------------------------------------------------
# Pure-JAX f32 reference (matches the PyTorch module's forward)
# ----------------------------------------------------------------------------
def reference_forward(params, x):
    h = jnp.maximum(x @ params["w1"] + params["b1"], 0.0)
    h = jnp.maximum(h @ params["w2"] + params["b2"], 0.0)
    return h @ params["w3"] + params["b3"]


if __name__ == "__main__":
    # Classic-control-like shapes: CartPole obs_dim=4, n_actions=2.
    obs_dim = 4
    n_actions = 2

    key = jax.random.PRNGKey(0)
    k_params, k_x1, k_x2 = jax.random.split(key, 3)
    params = init_params(k_params, obs_dim, n_actions)
    pparams = pad_params(params)

    fwd = jax.jit(functools.partial(qnet_forward, n_actions=n_actions))

    # Test 1: tiny acting batch (single grid step).
    x_small = jax.random.normal(k_x1, (2, obs_dim), jnp.float32)
    q_small = jax.block_until_ready(fwd(pparams, x_small))
    assert q_small.shape == (2, n_actions), q_small.shape
    assert q_small.dtype == jnp.float32
    ref_small = reference_forward(params, x_small)
    assert jnp.allclose(q_small, ref_small, atol=2e-2, rtol=2e-2), (
        jnp.max(jnp.abs(q_small - ref_small)))

    # Test 2: awkward batch (exercises 2-step grid + batch remainder padding).
    x_big = jax.random.normal(k_x2, (50, obs_dim), jnp.float32)
    q_big = jax.block_until_ready(fwd(pparams, x_big))
    assert q_big.shape == (50, n_actions), q_big.shape
    ref_big = reference_forward(params, x_big)
    assert jnp.allclose(q_big, ref_big, atol=2e-2, rtol=2e-2), (
        jnp.max(jnp.abs(q_big - ref_big)))

    print("KERNEL_OK")
</pallas_src>

<mosaic_0001>
module attributes {stable_mosaic.version = 11 : i64} {
  func.func @_mlp_kernel(%arg0: i32, %arg1: memref<8x8xbf16, #tpu.memory_space<vmem>>, %arg2: memref<8x128xbf16, #tpu.memory_space<vmem>>, %arg3: memref<1x128xf32, #tpu.memory_space<vmem>>, %arg4: memref<128x128xbf16, #tpu.memory_space<vmem>>, %arg5: memref<1x128xf32, #tpu.memory_space<vmem>>, %arg6: memref<128x128xbf16, #tpu.memory_space<vmem>>, %arg7: memref<1x128xf32, #tpu.memory_space<vmem>>, %arg8: memref<8x128xf32, #tpu.memory_space<vmem>>) attributes {dimension_semantics = [#tpu.dimension_semantics<parallel>], iteration_bounds = array<i64: 1>, scalar_prefetch = 0 : i64, scratch_operands = 0 : i64, tpu.core_type = #tpu.core_type<tc>, window_params = [{transform_indices = @transform_0, window_bounds = array<i64: 8, 8>}, {pipeline_mode = #tpu.pipeline_mode<synchronous>, transform_indices = @transform_1, window_bounds = array<i64: 8, 128>}, {pipeline_mode = #tpu.pipeline_mode<synchronous>, transform_indices = @transform_2, window_bounds = array<i64: 1, 128>}, {pipeline_mode = #tpu.pipeline_mode<synchronous>, transform_indices = @transform_3, window_bounds = array<i64: 128, 128>}, {pipeline_mode = #tpu.pipeline_mode<synchronous>, transform_indices = @transform_4, window_bounds = array<i64: 1, 128>}, {pipeline_mode = #tpu.pipeline_mode<synchronous>, transform_indices = @transform_5, window_bounds = array<i64: 128, 128>}, {pipeline_mode = #tpu.pipeline_mode<synchronous>, transform_indices = @transform_6, window_bounds = array<i64: 1, 128>}, {transform_indices = @transform_7, window_bounds = array<i64: 8, 128>}]} {
    %c0 = arith.constant 0 : index
    %c0_0 = arith.constant 0 : index
    %0 = vector.load %arg1[%c0, %c0_0] : memref<8x8xbf16, #tpu.memory_space<vmem>>, vector<8x8xbf16>
    %c0_1 = arith.constant 0 : index
    %c0_2 = arith.constant 0 : index
    %1 = vector.load %arg2[%c0_1, %c0_2] : memref<8x128xbf16, #tpu.memory_space<vmem>>, vector<8x128xbf16>
    %cst = arith.constant dense<0.000000e+00> : vector<8x128xf32>
    %2 = tpu.matmul %0, %1, %cst {dimension_numbers = #tpu.dot_dimension_numbers<[1], [0], [0], [1], [0, 0, 1, 1], [], []>} : vector<8x8xbf16>, vector<8x128xbf16>, vector<8x128xf32> -> vector<8x128xf32>
    %c0_3 = arith.constant 0 : index
    %c0_4 = arith.constant 0 : index
    %3 = vector.load %arg3[%c0_3, %c0_4] : memref<1x128xf32, #tpu.memory_space<vmem>>, vector<1x128xf32>
    %4 = vector.broadcast %3 : vector<1x128xf32> to vector<8x128xf32>
    %5 = arith.addf %2, %4 : vector<8x128xf32>
    %cst_5 = arith.constant 0.000000e+00 : f32
    %6 = vector.broadcast %cst_5 : f32 to vector<8x128xf32>
    %7 = arith.maximumf %5, %6 : vector<8x128xf32>
    %8 = arith.truncf %7 : vector<8x128xf32> to vector<8x128xbf16>
    %c0_6 = arith.constant 0 : index
    %c0_7 = arith.constant 0 : index
    %9 = vector.load %arg4[%c0_6, %c0_7] : memref<128x128xbf16, #tpu.memory_space<vmem>>, vector<128x128xbf16>
    %cst_8 = arith.constant dense<0.000000e+00> : vector<8x128xf32>
    %10 = tpu.matmul %8, %9, %cst_8 {dimension_numbers = #tpu.dot_dimension_numbers<[1], [0], [0], [1], [0, 0, 1, 1], [], []>} : vector<8x128xbf16>, vector<128x128xbf16>, vector<8x128xf32> -> vector<8x128xf32>
    %c0_9 = arith.constant 0 : index
    %c0_10 = arith.constant 0 : index
    %11 = vector.load %arg5[%c0_9, %c0_10] : memref<1x128xf32, #tpu.memory_space<vmem>>, vector<1x128xf32>
    %12 = vector.broadcast %11 : vector<1x128xf32> to vector<8x128xf32>
    %13 = arith.addf %10, %12 : vector<8x128xf32>
    %cst_11 = arith.constant 0.000000e+00 : f32
    %14 = vector.broadcast %cst_11 : f32 to vector<8x128xf32>
    %15 = arith.maximumf %13, %14 : vector<8x128xf32>
    %16 = arith.truncf %15 : vector<8x128xf32> to vector<8x128xbf16>
    %c0_12 = arith.constant 0 : index
    %c0_13 = arith.constant 0 : index
    %17 = vector.load %arg6[%c0_12, %c0_13] : memref<128x128xbf16, #tpu.memory_space<vmem>>, vector<128x128xbf16>
    %cst_14 = arith.constant dense<0.000000e+00> : vector<8x128xf32>
    %18 = tpu.matmul %16, %17, %cst_14 {dimension_numbers = #tpu.dot_dimension_numbers<[1], [0], [0], [1], [0, 0, 1, 1], [], []>} : vector<8x128xbf16>, vector<128x128xbf16>, vector<8x128xf32> -> vector<8x128xf32>
    %c0_15 = arith.constant 0 : index
    %c0_16 = arith.constant 0 : index
    %19 = vector.load %arg7[%c0_15, %c0_16] : memref<1x128xf32, #tpu.memory_space<vmem>>, vector<1x128xf32>
    %20 = vector.broadcast %19 : vector<1x128xf32> to vector<8x128xf32>
    %21 = arith.addf %18, %20 : vector<8x128xf32>
    %c0_17 = arith.constant 0 : index
    %c0_18 = arith.constant 0 : index
    %22 = vector.load %arg8[%c0_17, %c0_18] : memref<8x128xf32, #tpu.memory_space<vmem>>, vector<8x128xf32>
    tpu.vector_store %arg8[%c0_17, %c0_18], %21 {strides = array<i32>} : memref<8x128xf32, #tpu.memory_space<vmem>>, vector<8x128xf32>,
    return
  }
  func.func @transform_0(%arg0: i32) -> (i32, i32) {
    %c0_i32 = arith.constant 0 : i32
    %c0_i32_0 = arith.constant 0 : i32
    return %arg0, %c0_i32 : i32, i32
  }
  func.func @transform_1(%arg0: i32) -> (i32, i32) {
    %c0_i32 = arith.constant 0 : i32
    %c0_i32_0 = arith.constant 0 : i32
    %c0_i32_1 = arith.constant 0 : i32
    return %c0_i32, %c0_i32_0 : i32, i32
  }
  func.func @transform_2(%arg0: i32) -> (i32, i32) {
    %c0_i32 = arith.constant 0 : i32
    %c0_i32_0 = arith.constant 0 : i32
    %c0_i32_1 = arith.constant 0 : i32
    return %c0_i32, %c0_i32_0 : i32, i32
  }
  func.func @transform_3(%arg0: i32) -> (i32, i32) {
    %c0_i32 = arith.constant 0 : i32
    %c0_i32_0 = arith.constant 0 : i32
    %c0_i32_1 = arith.constant 0 : i32
    return %c0_i32, %c0_i32_0 : i32, i32
  }
  func.func @transform_4(%arg0: i32) -> (i32, i32) {
    %c0_i32 = arith.constant 0 : i32
    %c0_i32_0 = arith.constant 0 : i32
    %c0_i32_1 = arith.constant 0 : i32
    return %c0_i32, %c0_i32_0 : i32, i32
  }
  func.func @transform_5(%arg0: i32) -> (i32, i32) {
    %c0_i32 = arith.constant 0 : i32
    %c0_i32_0 = arith.constant 0 : i32
    %c0_i32_1 = arith.constant 0 : i32
    return %c0_i32, %c0_i32_0 : i32, i32
  }
  func.func @transform_6(%arg0: i32) -> (i32, i32) {
    %c0_i32 = arith.constant 0 : i32
    %c0_i32_0 = arith.constant 0 : i32
    %c0_i32_1 = arith.constant 0 : i32
    return %c0_i32, %c0_i32_0 : i32, i32
  }
  func.func @transform_7(%arg0: i32) -> (i32, i32) {
    %c0_i32 = arith.constant 0 : i32
    %c0_i32_0 = arith.constant 0 : i32
    return %arg0, %c0_i32 : i32, i32
  }
}

</mosaic_0001>

<bundles_post_ra>
// kernel: qnet_forward.1
= control target key start
LH: loop header
LB: loop body
LE: loop exit
PB: predicated region body
PF: predicated region fallthrough
CT: control target
= control target key end

     0   :  { %12 = vsyncpa [#allocation3], 0  ;;  %s612_s0 = inlined_call_operand.vmem [shape: bf16[8,8], index: 0, kind: input, shape index: {}]   ;;  %s613_s1 = inlined_call_operand.vmem [shape: bf16[8,128], index: 1, kind: input, shape index: {}]   ;;  %s614_s2 = inlined_call_operand.vmem [shape: f32[1,128], index: 2, kind: input, shape index: {}]   ;;  %s615_s3 = inlined_call_operand.hbm [shape: bf16[128,128], index: 3, kind: input, shape index: {}]   ;;  %s616_s4 = inlined_call_operand.vmem [shape: f32[1,128], index: 4, kind: input, shape index: {}]   ;;  %s617_s5 = inlined_call_operand.hbm [shape: bf16[128,128], index: 5, kind: input, shape index: {}]   ;;  %s618_s6 = inlined_call_operand.vmem [shape: f32[1,128], index: 6, kind: input, shape index: {}]   ;;  %s619_s7 = inlined_call_operand.vmem [shape: f32[8,128], index: 7, kind: output, shape index: {}]  }
   0x1   :  { %13 = vsyncpa [#allocation5], 0  ;;  %s501_s24 = smov [#allocation2]   ;;  %s453_s28 = scalar_lea.hbm %s615_s3, 1024 }
   0x2   :  { %s25_s25 = sshll.u32 %s501_s24, 4  ;;  %p454_p0 = scmp.ne.s32.totalorder %s615_s3, %s453_s28  ;;  %s26_s25 = int_to_ptr.vmem [resolvable:$true] %s25_s25 }
   0x3   :  { %p457_p1 = scmp.lt.u32.totalorder %s453_s28, %s615_s3 }
   0x5   :  { %p459_p2 = pnand %p457_p1, %p454_p0 }
   0x7   :  { %462 = shalt.err (!%p459_p2)
}
   0x8   :  { %s463_s10 = scalar_lea.vmem %s26_s25, 1024  ;;  %p468_p4 = scmp.lt.s32.totalorder %s26_s25, %s26_s25 }
   0x9   :  { %p464_p3 = scmp.ne.s32.totalorder %s26_s25, %s463_s10  ;;  %p469_p5 = scmp.lt.s32.totalorder %s463_s10, %s463_s10 }
   0xb   :  { %p470_p6 = por %p469_p5, %p468_p4 }
   0xd   :  { %p471_p7 = pnand %p470_p6, %p464_p3 }
   0xf   :  { %474 = shalt.err (!%p471_p7)
}
  0x10   :  { %s502_s11 = smov 64   ;;  %s503_s12 = smov 4  }
  0x11   :  { %31 = dma.hbm_to_vmem [thread:$0]  %s615_s3, 1024, %s26_s25, [#allocation3], %s502_s11, %s502_s11, %s503_s12  }
  0x12   :  { %s504_s15 = smov [#allocation4]   ;;  %s475_s19 = scalar_lea.hbm %s617_s5, 1024 }
  0x13   :  { %s39_s16 = sshll.u32 %s504_s15, 4  ;;  %p476_p8 = scmp.ne.s32.totalorder %s617_s5, %s475_s19  ;;  %s40_s16 = int_to_ptr.vmem [resolvable:$true] %s39_s16 }
  0x14   :  { %p479_p9 = scmp.lt.u32.totalorder %s475_s19, %s617_s5 }
  0x16   :  { %p481_p10 = pnand %p479_p9, %p476_p8 }
  0x18   :  { %484 = shalt.err (!%p481_p10)
}
  0x19   :  { %s485_s24 = scalar_lea.vmem %s40_s16, 1024  ;;  %p490_p12 = scmp.lt.s32.totalorder %s40_s16, %s40_s16 }
  0x1a   :  { %p486_p11 = scmp.ne.s32.totalorder %s40_s16, %s485_s24  ;;  %p491_p13 = scmp.lt.s32.totalorder %s485_s24, %s485_s24 }
  0x1c   :  { %p492_p0 = por %p491_p13, %p490_p12 }
  0x1e   :  { %p493_p1 = pnand %p492_p0, %p486_p11 }
  0x20   :  { %496 = shalt.err (!%p493_p1)
}
  0x21   :  { %45 = dma.hbm_to_vmem [thread:$0]  %s617_s5, 1024, %s40_s16, [#allocation5], %s502_s11, %s502_s11, %s503_s12  }
  0x22   :  { %497 = dma.done.wait [#allocation3], 1024  }
  0x23   :  { %498 = vsyncadd [#allocation3], 4294966272 }
  0x24   :  { %499 = dma.done.wait [#allocation5], 1024  }
  0x25   :  { %500 = vsyncadd [#allocation5], 4294966272  ;;  %v505_v0 = vmov 0.0   ;;  %vm506_vm0 = vmmov 0   ;;  %vm68_vm1 = vcmask 1043456   ;;  %vm64_vm2 = vcmask 64512  }
  0x26   :  { %385 = vmatprep.subr.bf16.mxu0 %v505_v0  ;;  %387 = vmatprep.mubr.msk.bf16.mxu0 %vm506_vm0, %v505_v0  ;;  %v56_v1 = vld [vmem:[%s613_s1] sm:$0xf]  ;;  %v438_v5 = vld [vmem:[#allocation2 + $0x8] sm:$0xff]   ;;  %v439_v6 = vld [vmem:[#allocation2 + $0x10] sm:$0xff]  }
  0x27   :  { %391 = vmatprep.subr.bf16.mxu1 %v505_v0  ;;  %407 = vmatprep.mubr.msk.bf16.mxu1 %vm506_vm0, %v505_v0  ;;  %v70_v2 = vsel %vm68_vm1, %v56_v1, 0  ;;  %v437_v3 = vld [vmem:[#allocation2] sm:$0xff]   ;;  %v440_v7 = vld [vmem:[#allocation2 + $0x18] sm:$0xff]   ;;  %v442_v9 = vld [vmem:[#allocation2 + $0x28] sm:$0xff]  }
  0x28   :  { %386 = vmatpush3.bf16.msra.mxu0 %v70_v2  ;;  %v55_v4 = vld [vmem:[%s612_s0] sm:$0xf]  ;;  %392 = vmatpush3.bf16.msra.mxu1 %v437_v3  ;;  %v443_v10 = vld [vmem:[#allocation2 + $0x30] sm:$0xff]   ;;  %v444_v11 = vld [vmem:[#allocation2 + $0x38] sm:$0xff]  }
  0x29   :  { %411 = vmatprep.subr.bf16.mxu0 %v505_v0  ;;  %393 = vmatprep.subr.bf16.mxu1 %v505_v0  ;;  %v441_v8 = vld [vmem:[#allocation2 + $0x20] sm:$0xff]   ;;  %v446_v13 = vld [vmem:[#allocation4 + $0x8] sm:$0xff]   ;;  %v447_v14 = vld [vmem:[#allocation4 + $0x10] sm:$0xff]  }
  0x2a   :  { %v445_v12 = vld [vmem:[#allocation4] sm:$0xff]   ;;  %v448_v15 = vld [vmem:[#allocation4 + $0x18] sm:$0xff]   ;;  %v450_v17 = vld [vmem:[#allocation4 + $0x28] sm:$0xff]  }
  0x2b   :  { %388 = vmatmul.mubr.msk.bf16.vlgmr.msra.gmra.mrb[0].mxu0 %vm64_vm2, %v55_v4  ;;  %v449_v16 = vld [vmem:[#allocation4 + $0x20] sm:$0xff]   ;;  %v451_v26 = vld [vmem:[#allocation4 + $0x30] sm:$0xff]   ;;  %v452_v27 = vld [vmem:[#allocation4 + $0x38] sm:$0xff]  }
  0x2c   :  { %427 = vmatprep.mubr.msk.bf16.mxu0 %vm506_vm0, %v505_v0  ;;  %394 = vmatpush3.bf16.msra.mxu1 %v438_v5  ;;  %v345_v18 = vld [vmem:[%s614_s2] ss:$0 sm:$0xff] }
  0x2d   :  { %395 = vmatprep.subr.bf16.mxu1 %v505_v0  ;;  %412 = vmatpush3.bf16.msra.mxu0 %v445_v12  ;;  %v347_v28 = vld [vmem:[%s616_s4] ss:$0 sm:$0xff] }
  0x2e   :  { %413 = vmatprep.subr.bf16.mxu0 %v505_v0  ;;  %v356_v36 = vld [vmem:[%s618_s6] ss:$0 sm:$0xff] }
  0x30   :  { %396 = vmatpush3.bf16.msra.mxu1 %v439_v6 }
  0x31   :  { %397 = vmatprep.subr.bf16.mxu1 %v505_v0  ;;  %414 = vmatpush3.bf16.msra.mxu0 %v446_v13 }
  0x32   :  { %415 = vmatprep.subr.bf16.mxu0 %v505_v0 }
  0x34   :  { %398 = vmatpush3.bf16.msra.mxu1 %v440_v7 }
  0x35   :  { %399 = vmatprep.subr.bf16.mxu1 %v505_v0  ;;  %416 = vmatpush3.bf16.msra.mxu0 %v447_v14 }
  0x36   :  { %417 = vmatprep.subr.bf16.mxu0 %v505_v0 }
  0x38   :  { %400 = vmatpush3.bf16.msra.mxu1 %v441_v8 }
  0x39   :  { %401 = vmatprep.subr.bf16.mxu1 %v505_v0  ;;  %418 = vmatpush3.bf16.msra.mxu0 %v448_v15 }
  0x3a   :  { %419 = vmatprep.subr.bf16.mxu0 %v505_v0 }
  0x3c   :  { %402 = vmatpush3.bf16.msra.mxu1 %v442_v9 }
  0x3d   :  { %403 = vmatprep.subr.bf16.mxu1 %v505_v0  ;;  %420 = vmatpush3.bf16.msra.mxu0 %v449_v16 }
  0x3e   :  { %421 = vmatprep.subr.bf16.mxu0 %v505_v0 }
  0x40   :  { %404 = vmatpush3.bf16.msra.mxu1 %v443_v10 }
  0x41   :  { %405 = vmatprep.subr.bf16.mxu1 %v505_v0  ;;  %422 = vmatpush3.bf16.msra.mxu0 %v450_v17 }
  0x42   :  { %423 = vmatprep.subr.bf16.mxu0 %v505_v0 }
  0x44   :  { %406 = vmatpush3.bf16.msra.mxu1 %v444_v11 }
  0x45   :  { %424 = vmatpush3.bf16.msra.mxu0 %v451_v26 }
  0x46   :  { %425 = vmatprep.subr.bf16.mxu0 %v505_v0 }
  0x49   :  { %426 = vmatpush3.bf16.msra.mxu0 %v452_v27 }
  0xfe   :  { %v106_v19 = vpop.f32.mrb[0].mxu0 }
  0xff   :  { %v107_v20 = vadd.f32 %v345_v18, %v106_v19  ;;  %v389_v21 = vpop.f32.mrb[1].mxu0 }
 0x100   :  { %v109_v22 = vpop.f32.mrb[2].mxu0 }
 0x101   :  { %v112_v23 = vmax.f32 %v107_v20, 0.0  ;;  %v390_v24 = vpop.f32.mrb[3].mxu0 }
 0x103   :  { %v113_v25 = vpack.c.bf16 %v112_v23, %v112_v23 }
 0x105   :  { %408 = vmatmul.mubr.bf16.vlgmr.msra.gmra.mrb[0].mxu1 %v113_v25 }
 0x1d8   :  { %v219_v29 = vpop.f32.mrb[0].mxu1 }
 0x1d9   :  { %v220_v30 = vadd.f32 %v347_v28, %v219_v29  ;;  %v409_v31 = vpop.f32.mrb[1].mxu1 }
 0x1da   :  { %v222_v32 = vpop.f32.mrb[2].mxu1 }
 0x1db   :  { %v225_v33 = vmax.f32 %v220_v30, 0.0  ;;  %v410_v34 = vpop.f32.mrb[3].mxu1 }
 0x1dd   :  { %v226_v35 = vpack.c.bf16 %v225_v33, %v225_v33 }
 0x1df   :  { %428 = vmatmul.mubr.bf16.vlgmr.msra.gmra.mrb[4].mxu0 %v226_v35 }
 0x2b2   :  { %v332_v37 = vpop.f32.mrb[4].mxu0 }
 0x2b3   :  { %v333_v38 = vadd.f32 %v356_v36, %v332_v37  ;;  %v429_v39 = vpop.f32.mrb[5].mxu0 }
 0x2b4   :  { %v335_v40 = vpop.f32.mrb[6].mxu0 }
 0x2b5   :  { %338 = vst [vmem:[%s619_s7] sm:$0xff] %v333_v38  ;;  %v430_v41 = vpop.f32.mrb[7].mxu0 }
 0x2b6   :  { %343 = vsyncpa [#allocation3], 1 }
 0x2b7   :  { %344 = vsyncpa [#allocation5], 1 }

</bundles_post_ra>
